<compile_context>
chip_gen: v7x
topology: tpu7x:2x2x1
jax: 0.10.0
libtpu: 0.0.40
codegen_flags: <defaults>
</compile_context>

<pallas_src>
import functools

import jax
import jax.numpy as jnp
from jax import lax
from jax.experimental import pallas as pl
from jax.experimental.pallas import tpu as pltpu

BN_EPS = 1e-5

# MXU operand dtype for the conv matmuls.  bf16 is the right choice on v6e/v7x
# (bf16-native MXU, half the x/band DMA bytes; accumulation stays f32), but it loosens
# the max-abs error beyond the strict 1e-3 f32 reference check used in __main__,
# so the default here is f32.
MXU_INPUT_DTYPE = jnp.float32


def _fused_conv_bn_kernel(x_ref, band_ref, params_ref, rmat_ref, out_ref, *, inv_cnt):
    """Fused conv3x3(reflect) + bias + ReLU + BatchNorm2d(train) + Dropout2d(p=0).

    x_ref     : (N, H+2, W*Cin)    image rows, reflect-padded in H only (the W reflect is
                                   folded into the banded weights); (W, Cin) merged on lanes
    band_ref  : (3, W*Cin, W*Cout) banded weights, one per ky row tap
    params_ref: (3, W*Cout)        rows = [conv bias, BN gamma, BN beta], tiled over w
    rmat_ref  : (W*Cout, W*Cout)   0/1 matrix; right-multiplying a per-(w,cout) row vector
                                   by it gives the per-cout total broadcast to every w lane
    out_ref   : (N*H, W*Cout)      lane-dense output slab
    """
    n, hp2, k = x_ref.shape
    h = hp2 - 2
    m = out_ref.shape[0]                      # = n * h

    xw = x_ref[...]                           # one contiguous load of the whole slab

    # --- 3x3 conv as 3 accumulating MXU matmuls (one per ky row tap), f32 accumulation.
    # (With K = W*Cin = 64 the taps could be fused into one 192-deep matmul on v6e/v7x;
    #  kept as 3 taps for simple, robust lowering -- the MXU time here is negligible.)
    acc = jnp.dot(xw[:, 0:h, :].reshape(m, k), band_ref[0],
                  preferred_element_type=jnp.float32)
    for ky in (1, 2):
        acc = acc + jnp.dot(xw[:, ky:ky + h, :].reshape(m, k), band_ref[ky],
                            preferred_element_type=jnp.float32)

    bias = params_ref[0:1, :]
    y = jnp.maximum(acc + bias, 0.0)          # conv + bias + ReLU, (M, L) f32

    # --- BatchNorm2d training-mode statistics, fully in-kernel.
    # Sublane-reduce the rows, then reduce over the w lanes (and broadcast back) with one
    # tiny MXU matmul against rmat -- no cross-lane shuffles on the VPU/XLU path.
    s = jnp.sum(y, axis=0, keepdims=True)                  # (1, L) per-(w,cout) sum
    ssq = jnp.sum(y * y, axis=0, keepdims=True)            # (1, L) per-(w,cout) sum sq
    ch_sum = jnp.dot(s, rmat_ref[...], preferred_element_type=jnp.float32)
    ch_ssq = jnp.dot(ssq, rmat_ref[...], preferred_element_type=jnp.float32)

    mean = ch_sum * inv_cnt
    # NOTE: var = E[y^2] - mean^2 in f32; safe at these magnitudes / tolerance.  Use a
    # shifted / Welford accumulation if stats accumulation ever drops below f32.
    var = ch_ssq * inv_cnt - mean * mean
    inv_std = lax.rsqrt(var + BN_EPS)
    scale = params_ref[1:2, :] * inv_std                   # gamma * inv_std (per lane)
    shift = params_ref[2:3, :] - mean * scale              # beta - mean * scale

    # Dropout2d(p=0) is the identity.
    # TODO(synk): for dropout_prob > 0 in training mode, draw per-(image, channel) masks
    # via pltpu.prng_seed / pltpu.prng_random_bits and scale by 1/(1-p).
    out_ref[...] = (y * scale + shift).astype(out_ref.dtype)


@jax.jit
def conv_block_forward(x_nchw, w_oihw, bias, gamma, beta):
    """x_nchw: (N, Cin, H, W) f32 -> (N, Cout, H, W) f32 (training-mode BN, p=0 dropout)."""
    N, Cin, H, W = x_nchw.shape
    Cout = w_oihw.shape[0]
    K = W * Cin          # contraction width per ky row tap
    L = W * Cout         # lane width of the activation slab (=128 for the test shape)

    # NCHW -> (N, H, W*Cin); reflect-pad rows only (the W reflect is folded into band).
    x_rows = jnp.transpose(x_nchw, (0, 2, 3, 1)).reshape(N, H, K)
    xp = jnp.pad(x_rows, ((0, 0), (1, 1), (0, 0)), mode="reflect").astype(MXU_INPUT_DTYPE)

    # Banded weights with the width reflect folded in:
    #   band[ky, wi*Cin+ci, wo*Cout+co] = sum_kx W[co,ci,ky,kx] * [reflectW(wo+kx-1) == wi]
    wt = jnp.transpose(w_oihw, (2, 3, 1, 0)).astype(jnp.float32)   # (ky, kx, Cin, Cout)
    src = jnp.arange(W)[None, :] + jnp.arange(3)[:, None] - 1      # (kx, wo) source col
    src = jnp.abs(src)                                             # left-edge reflect
    src = jnp.where(src > W - 1, 2 * (W - 1) - src, src)           # right-edge reflect
    sel = (src[:, :, None] == jnp.arange(W)[None, None, :]).astype(jnp.float32)  # (kx,wo,wi)
    band = jnp.einsum("xow,yxic->ywioc", sel, wt).reshape(3, K, L).astype(MXU_INPUT_DTYPE)

    # Per-lane epilogue params (lane = w*Cout + cout): rows = [bias, gamma, beta].
    params = jnp.stack([jnp.tile(bias.astype(jnp.float32), W),
                        jnp.tile(gamma.astype(jnp.float32), W),
                        jnp.tile(beta.astype(jnp.float32), W)], axis=0)        # (3, L)

    # Channel reduce/broadcast matrix: rmat[i, j] = 1 iff lanes i and j hold the same cout.
    lane_c = jnp.arange(L) % Cout
    rmat = (lane_c[:, None] == lane_c[None, :]).astype(jnp.float32)            # (L, L)

    flops = 2 * N * H * K * L * 3 + 2 * 2 * L * L
    bytes_accessed = (xp.size * xp.dtype.itemsize + band.size * band.dtype.itemsize
                      + params.size * 4 + rmat.size * 4 + N * H * L * 4)

    # Single fused pallas_call, one grid step: whole problem is a few hundred KB of VMEM
    # and ~1 us of MXU work, so per-image grid steps / separate passes are pure overhead.
    out2d = pl.pallas_call(
        functools.partial(_fused_conv_bn_kernel, inv_cnt=1.0 / float(N * H * W)),
        out_shape=jax.ShapeDtypeStruct((N * H, L), jnp.float32),
        grid=(1,),
        in_specs=[
            pl.BlockSpec((N, H + 2, K), lambda i: (0, 0, 0)),
            pl.BlockSpec((3, K, L), lambda i: (0, 0, 0)),
            pl.BlockSpec((3, L), lambda i: (0, 0)),
            pl.BlockSpec((L, L), lambda i: (0, 0)),
        ],
        out_specs=pl.BlockSpec((N * H, L), lambda i: (0, 0)),
        compiler_params=pltpu.CompilerParams(dimension_semantics=("arbitrary",)),
        cost_estimate=pl.CostEstimate(flops=flops, transcendentals=L,
                                      bytes_accessed=bytes_accessed),
    )(xp, band, params, rmat)

    # (N*H, W*Cout) -> NHWC -> NCHW
    return jnp.transpose(out2d.reshape(N, H, W, Cout), (0, 3, 1, 2))


def _reference(x_nchw, w_oihw, bias, gamma, beta):
    """Pure-JAX reference of the PyTorch module (training-mode BN, p=0 dropout)."""
    x_nhwc = jnp.transpose(x_nchw, (0, 2, 3, 1))
    xp = jnp.pad(x_nhwc, ((0, 0), (1, 1), (1, 1), (0, 0)), mode="reflect")
    w_hwio = jnp.transpose(w_oihw, (2, 3, 1, 0))
    y = lax.conv_general_dilated(
        xp, w_hwio, window_strides=(1, 1), padding="VALID",
        dimension_numbers=("NHWC", "HWIO", "NHWC"))
    y = jnp.maximum(y + bias.reshape(1, 1, 1, -1), 0.0)
    mean = jnp.mean(y, axis=(0, 1, 2), keepdims=True)
    var = jnp.mean((y - mean) ** 2, axis=(0, 1, 2), keepdims=True)
    y = (y - mean) * lax.rsqrt(var + BN_EPS)
    y = y * gamma.reshape(1, 1, 1, -1) + beta.reshape(1, 1, 1, -1)
    return jnp.transpose(y, (0, 3, 1, 2))


if __name__ == "__main__":
    N, Cin, Cout, H, W = 2, 4, 8, 16, 16

    key = jax.random.PRNGKey(0)
    kx_, kw_, kb_, kg_, kbt_ = jax.random.split(key, 5)
    x = jax.random.normal(kx_, (N, Cin, H, W), dtype=jnp.float32)

    # Deterministic synthetic parameters (shapes per nn.Conv2d / nn.BatchNorm2d).
    fan_in = Cin * 3 * 3
    bound = 1.0 / (fan_in ** 0.5)
    w = jax.random.uniform(kw_, (Cout, Cin, 3, 3), jnp.float32, -bound, bound)
    b = jax.random.uniform(kb_, (Cout,), jnp.float32, -bound, bound)
    gamma = 1.0 + 0.1 * jax.random.normal(kg_, (Cout,), jnp.float32)
    beta = 0.1 * jax.random.normal(kbt_, (Cout,), jnp.float32)

    out = jax.block_until_ready(conv_block_forward(x, w, b, gamma, beta))
    ref = jax.block_until_ready(_reference(x, w, b, gamma, beta))

    assert out.shape == (N, Cout, H, W)
    err = float(jnp.max(jnp.abs(out - ref)))
    assert err < 1e-3, f"Pallas output mismatch vs reference: max abs err = {err}"

    print("KERNEL_OK")
</pallas_src>

<mosaic_0001>
module attributes {stable_mosaic.version = 11 : i64} {
  func.func @_fused_conv_bn_kernel(%arg0: i32, %arg1: memref<2x18x64xf32, #tpu.memory_space<vmem>>, %arg2: memref<3x64x128xf32, #tpu.memory_space<vmem>>, %arg3: memref<3x128xf32, #tpu.memory_space<vmem>>, %arg4: memref<128x128xf32, #tpu.memory_space<vmem>>, %arg5: memref<32x128xf32, #tpu.memory_space<vmem>>) attributes {dimension_semantics = [#tpu.dimension_semantics<arbitrary>], iteration_bounds = array<i64: 1>, scalar_prefetch = 0 : i64, scratch_operands = 0 : i64, tpu.core_type = #tpu.core_type<tc>, window_params = [{pipeline_mode = #tpu.pipeline_mode<synchronous>, transform_indices = @transform_0, window_bounds = array<i64: 2, 18, 64>}, {pipeline_mode = #tpu.pipeline_mode<synchronous>, transform_indices = @transform_1, window_bounds = array<i64: 3, 64, 128>}, {pipeline_mode = #tpu.pipeline_mode<synchronous>, transform_indices = @transform_2, window_bounds = array<i64: 3, 128>}, {pipeline_mode = #tpu.pipeline_mode<synchronous>, transform_indices = @transform_3, window_bounds = array<i64: 128, 128>}, {pipeline_mode = #tpu.pipeline_mode<synchronous>, transform_indices = @transform_4, window_bounds = array<i64: 32, 128>}]} {
    %c0 = arith.constant 0 : index
    %c0_0 = arith.constant 0 : index
    %c0_1 = arith.constant 0 : index
    %0 = vector.load %arg1[%c0, %c0_0, %c0_1] : memref<2x18x64xf32, #tpu.memory_space<vmem>>, vector<2x18x64xf32>
    %1 = vector.extract_strided_slice %0 {offsets = [0, 0, 0], sizes = [2, 16, 64], strides = [1, 1, 1]} : vector<2x18x64xf32> to vector<2x16x64xf32>
    %2 = vector.shape_cast %1 : vector<2x16x64xf32> to vector<32x64xf32>
    %c0_2 = arith.constant 0 : index
    %c0_3 = arith.constant 0 : index
    %c0_4 = arith.constant 0 : index
    %3 = vector.load %arg2[%c0_2, %c0_3, %c0_4] : memref<3x64x128xf32, #tpu.memory_space<vmem>>, vector<1x64x128xf32>
    %4 = vector.shape_cast %3 : vector<1x64x128xf32> to vector<64x128xf32>
    %cst = arith.constant dense<0.000000e+00> : vector<32x128xf32>
    %5 = tpu.matmul %2, %4, %cst {dimension_numbers = #tpu.dot_dimension_numbers<[1], [0], [0], [1], [0, 0, 1, 1], [], []>} : vector<32x64xf32>, vector<64x128xf32>, vector<32x128xf32> -> vector<32x128xf32>
    %6 = vector.extract_strided_slice %0 {offsets = [0, 1, 0], sizes = [2, 16, 64], strides = [1, 1, 1]} : vector<2x18x64xf32> to vector<2x16x64xf32>
    %7 = vector.shape_cast %6 : vector<2x16x64xf32> to vector<32x64xf32>
    %c1 = arith.constant 1 : index
    %c0_5 = arith.constant 0 : index
    %c0_6 = arith.constant 0 : index
    %8 = vector.load %arg2[%c1, %c0_5, %c0_6] : memref<3x64x128xf32, #tpu.memory_space<vmem>>, vector<1x64x128xf32>
    %9 = vector.shape_cast %8 : vector<1x64x128xf32> to vector<64x128xf32>
    %cst_7 = arith.constant dense<0.000000e+00> : vector<32x128xf32>
    %10 = tpu.matmul %7, %9, %cst_7 {dimension_numbers = #tpu.dot_dimension_numbers<[1], [0], [0], [1], [0, 0, 1, 1], [], []>} : vector<32x64xf32>, vector<64x128xf32>, vector<32x128xf32> -> vector<32x128xf32>
    %11 = arith.addf %5, %10 : vector<32x128xf32>
    %12 = vector.extract_strided_slice %0 {offsets = [0, 2, 0], sizes = [2, 16, 64], strides = [1, 1, 1]} : vector<2x18x64xf32> to vector<2x16x64xf32>
    %13 = vector.shape_cast %12 : vector<2x16x64xf32> to vector<32x64xf32>
    %c2 = arith.constant 2 : index
    %c0_8 = arith.constant 0 : index
    %c0_9 = arith.constant 0 : index
    %14 = vector.load %arg2[%c2, %c0_8, %c0_9] : memref<3x64x128xf32, #tpu.memory_space<vmem>>, vector<1x64x128xf32>
    %15 = vector.shape_cast %14 : vector<1x64x128xf32> to vector<64x128xf32>
    %cst_10 = arith.constant dense<0.000000e+00> : vector<32x128xf32>
    %16 = tpu.matmul %13, %15, %cst_10 {dimension_numbers = #tpu.dot_dimension_numbers<[1], [0], [0], [1], [0, 0, 1, 1], [], []>} : vector<32x64xf32>, vector<64x128xf32>, vector<32x128xf32> -> vector<32x128xf32>
    %17 = arith.addf %11, %16 : vector<32x128xf32>
    %c0_11 = arith.constant 0 : index
    %c0_12 = arith.constant 0 : index
    %18 = vector.load %arg3[%c0_11, %c0_12] : memref<3x128xf32, #tpu.memory_space<vmem>>, vector<1x128xf32>
    %19 = vector.broadcast %18 : vector<1x128xf32> to vector<32x128xf32>
    %20 = arith.addf %17, %19 : vector<32x128xf32>
    %cst_13 = arith.constant 0.000000e+00 : f32
    %21 = vector.broadcast %cst_13 : f32 to vector<32x128xf32>
    %22 = arith.maximumf %20, %21 : vector<32x128xf32>
    %cst_14 = arith.constant dense<0.000000e+00> : vector<128xf32>
    %23 = vector.multi_reduction <add>, %22, %cst_14 [0] : vector<32x128xf32> to vector<128xf32>
    %24 = vector.shape_cast %23 : vector<128xf32> to vector<1x128xf32>
    %25 = arith.mulf %22, %22 : vector<32x128xf32>
    %cst_15 = arith.constant dense<0.000000e+00> : vector<128xf32>
    %26 = vector.multi_reduction <add>, %25, %cst_15 [0] : vector<32x128xf32> to vector<128xf32>
    %27 = vector.shape_cast %26 : vector<128xf32> to vector<1x128xf32>
    %c0_16 = arith.constant 0 : index
    %c0_17 = arith.constant 0 : index
    %28 = vector.load %arg4[%c0_16, %c0_17] : memref<128x128xf32, #tpu.memory_space<vmem>>, vector<128x128xf32>
    %cst_18 = arith.constant dense<0.000000e+00> : vector<1x128xf32>
    %29 = tpu.matmul %24, %28, %cst_18 {dimension_numbers = #tpu.dot_dimension_numbers<[1], [0], [0], [1], [0, 0, 1, 1], [], []>} : vector<1x128xf32>, vector<128x128xf32>, vector<1x128xf32> -> vector<1x128xf32>
    %c0_19 = arith.constant 0 : index
    %c0_20 = arith.constant 0 : index
    %30 = vector.load %arg4[%c0_19, %c0_20] : memref<128x128xf32, #tpu.memory_space<vmem>>, vector<128x128xf32>
    %cst_21 = arith.constant dense<0.000000e+00> : vector<1x128xf32>
    %31 = tpu.matmul %27, %30, %cst_21 {dimension_numbers = #tpu.dot_dimension_numbers<[1], [0], [0], [1], [0, 0, 1, 1], [], []>} : vector<1x128xf32>, vector<128x128xf32>, vector<1x128xf32> -> vector<1x128xf32>
    %cst_22 = arith.constant 0.001953125 : f32
    %32 = vector.broadcast %cst_22 : f32 to vector<1x128xf32>
    %33 = arith.mulf %29, %32 : vector<1x128xf32>
    %cst_23 = arith.constant 0.001953125 : f32
    %34 = vector.broadcast %cst_23 : f32 to vector<1x128xf32>
    %35 = arith.mulf %31, %34 : vector<1x128xf32>
    %36 = arith.mulf %33, %33 : vector<1x128xf32>
    %37 = arith.subf %35, %36 : vector<1x128xf32>
    %cst_24 = arith.constant 9.99999974E-6 : f32
    %38 = vector.broadcast %cst_24 : f32 to vector<1x128xf32>
    %39 = arith.addf %37, %38 : vector<1x128xf32>
    %40 = math.rsqrt %39 : vector<1x128xf32>
    %c1_25 = arith.constant 1 : index
    %c0_26 = arith.constant 0 : index
    %41 = vector.load %arg3[%c1_25, %c0_26] : memref<3x128xf32, #tpu.memory_space<vmem>>, vector<1x128xf32>
    %42 = arith.mulf %41, %40 : vector<1x128xf32>
    %c2_27 = arith.constant 2 : index
    %c0_28 = arith.constant 0 : index
    %43 = vector.load %arg3[%c2_27, %c0_28] : memref<3x128xf32, #tpu.memory_space<vmem>>, vector<1x128xf32>
    %44 = arith.mulf %33, %42 : vector<1x128xf32>
    %45 = arith.subf %43, %44 : vector<1x128xf32>
    %46 = vector.broadcast %42 : vector<1x128xf32> to vector<32x128xf32>
    %47 = arith.mulf %22, %46 : vector<32x128xf32>
    %48 = vector.broadcast %45 : vector<1x128xf32> to vector<32x128xf32>
    %49 = arith.addf %47, %48 : vector<32x128xf32>
    %c0_29 = arith.constant 0 : index
    %c0_30 = arith.constant 0 : index
    %50 = vector.load %arg5[%c0_29, %c0_30] : memref<32x128xf32, #tpu.memory_space<vmem>>, vector<32x128xf32>
    tpu.vector_store %arg5[%c0_29, %c0_30], %49 {strides = array<i32>} : memref<32x128xf32, #tpu.memory_space<vmem>>, vector<32x128xf32>,
    return
  }
  func.func @transform_0(%arg0: i32) -> (i32, i32, i32) {
    %c0_i32 = arith.constant 0 : i32
    %c0_i32_0 = arith.constant 0 : i32
    %c0_i32_1 = arith.constant 0 : i32
    %c0_i32_2 = arith.constant 0 : i32
    return %c0_i32, %c0_i32_0, %c0_i32_1 : i32, i32, i32
  }
  func.func @transform_1(%arg0: i32) -> (i32, i32, i32) {
    %c0_i32 = arith.constant 0 : i32
    %c0_i32_0 = arith.constant 0 : i32
    %c0_i32_1 = arith.constant 0 : i32
    %c0_i32_2 = arith.constant 0 : i32
    return %c0_i32, %c0_i32_0, %c0_i32_1 : i32, i32, i32
  }
  func.func @transform_2(%arg0: i32) -> (i32, i32) {
    %c0_i32 = arith.constant 0 : i32
    %c0_i32_0 = arith.constant 0 : i32
    %c0_i32_1 = arith.constant 0 : i32
    return %c0_i32, %c0_i32_0 : i32, i32
  }
  func.func @transform_3(%arg0: i32) -> (i32, i32) {
    %c0_i32 = arith.constant 0 : i32
    %c0_i32_0 = arith.constant 0 : i32
    %c0_i32_1 = arith.constant 0 : i32
    return %c0_i32, %c0_i32_0 : i32, i32
  }
  func.func @transform_4(%arg0: i32) -> (i32, i32) {
    %c0_i32 = arith.constant 0 : i32
    %c0_i32_0 = arith.constant 0 : i32
    %c0_i32_1 = arith.constant 0 : i32
    return %c0_i32, %c0_i32_0 : i32, i32
  }
}

</mosaic_0001>

<bundles_post_ra>
// kernel: tile.18
= control target key start
LH: loop header
LB: loop body
LE: loop exit
PB: predicated region body
PF: predicated region fallthrough
CT: control target
= control target key end

     0   :  { %s28_s0 = inlined_call_operand.vmem [shape: f32[8], index: 0, kind: input, shape index: {}]   ;;  %s29_s1 = inlined_call_operand.vmem [shape: f32[16,8], index: 1, kind: output, shape index: {}]  }
   0x1   :  { %v4_v0 = vld [vmem:[%s28_s0] ss:$0 sm:$0xff] }
   0x2   :  { %5 = vst [vmem:[%s29_s1] sm:$0xff] %v4_v0  ;;  %8 = vst [vmem:[%s29_s1 + $0x8] sm:$0xff] %v4_v0 }

// kernel: tile.27
= control target key start
LH: loop header
LB: loop body
LE: loop exit
PB: predicated region body
PF: predicated region fallthrough
CT: control target
= control target key end

     0   :  { %s131_s10 = smov 120   ;;  %s132_s11 = smov 104   ;;  %vm3_vm0 = vcmask 64512   ;;  %vm9_vm1 = vcmask 1048512   ;;  %vm15_vm2 = vcmask 982912   ;;  %vm21_vm3 = vcmask 917312   ;;  %s207_s0 = inlined_call_operand.vmem [shape: f32[16,8], index: 0, kind: input, shape index: {}]   ;;  %s208_s1 = inlined_call_operand.vmem [shape: f32[1,128], index: 1, kind: output, shape index: {}]  }
   0x1   :  { %v101_v0 = vld [vmem:[%s207_s0 + $0xf] sm:$0x1]   ;;  %v103_v1 = vld [vmem:[%s207_s0 + $0xd] sm:$0x1]   ;;  %v102_v2 = vld [vmem:[%s207_s0 + $0xe] sm:$0x1]  }
   0x2   :  { %7 = vrot.lane.b32.xlu0 %v101_v0, %s131_s10  ;;  %19 = vrot.lane.b32.xlu1 %v103_v1, %s132_s11  ;;  %v104_v3 = vld [vmem:[%s207_s0 + $0xc] sm:$0x1]   ;;  %s133_s16 = smov 112   ;;  %s134_s17 = smov 96   ;;  %v105_v4 = vld [vmem:[%s207_s0 + $0xb] sm:$0x1]  }
   0x3   :  { %v106_v5 = vld [vmem:[%s207_s0 + $0xa] sm:$0x1]   ;;  %v2_v6 = vld [vmem:[%s207_s0] sm:$0x1]   ;;  %s135_s24 = smov 88   ;;  %s136_s25 = smov 80  }
   0x4   :  { %4 = vst.msk [vmem:[#allocation0] sm:$0x1] %vm3_vm0, %v2_v6   ;;  %v107_v7 = vld [vmem:[%s207_s0 + $0x9] sm:$0x1]   ;;  %v108_v8 = vld [vmem:[%s207_s0 + $0x8] sm:$0x1]  }
   0x5   :  { %s137_s30 = smov 72   ;;  %s138_s2 = smov 64   ;;  %v109_v9 = vld [vmem:[%s207_s0 + $0x7] sm:$0x1]   ;;  %v110_v10 = vld [vmem:[%s207_s0 + $0x6] sm:$0x1]  }
   0x6   :  { %13 = vrot.lane.b32.xlu0 %v102_v2, %s133_s16  ;;  %25 = vrot.lane.b32.xlu1 %v104_v3, %s134_s17  ;;  %s139_s7 = smov 56   ;;  %s140_s8 = smov 48   ;;  %v111_v11 = vld [vmem:[%s207_s0 + $0x5] sm:$0x1]   ;;  %v112_v12 = vld [vmem:[%s207_s0 + $0x4] sm:$0x1]  }
   0x7   :  { %s141_s13 = smov 40   ;;  %s142_s14 = smov 32   ;;  %v113_v13 = vld [vmem:[%s207_s0 + $0x3] sm:$0x1]   ;;  %v114_v14 = vld [vmem:[%s207_s0 + $0x2] sm:$0x1]  }
   0x8   :  { %s143_s19 = smov 24   ;;  %s144_s20 = smov 16   ;;  %v115_v15 = vld [vmem:[%s207_s0 + $0x1] sm:$0x1]   ;;  %vm27_vm4 = vcmask 851712   ;;  %vm33_vm5 = vcmask 786112  }
   0x9   :  { %s145_s0 = smov 8   ;;  %vm39_vm6 = vcmask 720512   ;;  %vm45_vm7 = vcmask 654912   ;;  %vm51_vm8 = vcmask 589312   ;;  %vm57_vm9 = vcmask 523712  }
   0xa   :  { %31 = vrot.lane.b32.xlu0 %v105_v4, %s135_s24  ;;  %37 = vrot.lane.b32.xlu1 %v106_v5, %s136_s25  ;;  %vm63_vm10 = vcmask 458112   ;;  %vm69_vm11 = vcmask 392512   ;;  %vm75_vm12 = vcmask 326912   ;;  %vm81_vm13 = vcmask 261312  }
   0xb   :  { %vm87_vm14 = vcmask 195712   ;;  %vm93_vm15 = vcmask 130112  }
   0xe   :  { %43 = vrot.lane.b32.xlu0 %v107_v7, %s137_s30  ;;  %49 = vrot.lane.b32.xlu1 %v108_v8, %s138_s2 }
  0x12   :  { %55 = vrot.lane.b32.xlu0 %v109_v9, %s139_s7  ;;  %61 = vrot.lane.b32.xlu1 %v110_v10, %s140_s8 }
  0x16   :  { %67 = vrot.lane.b32.xlu0 %v111_v11, %s141_s13  ;;  %73 = vrot.lane.b32.xlu1 %v112_v12, %s142_s14 }
  0x1a   :  { %79 = vrot.lane.b32.xlu0 %v113_v13, %s143_s19  ;;  %85 = vrot.lane.b32.xlu1 %v114_v14, %s144_s20 }
  0x1e   :  { %91 = vrot.lane.b32.xlu0 %v115_v15, %s145_s0 }
  0x74   :  { %v8_v16 = vpop.permute.xlu0 %7   ;;  %v20_v17 = vpop.permute.xlu1 %19  }
  0x75   :  { %10 = vst.msk [vmem:[#allocation0] sm:$0x1] %vm9_vm1, %v8_v16  }
  0x78   :  { %v14_v18 = vpop.permute.xlu0 %13   ;;  %v26_v19 = vpop.permute.xlu1 %25  }
  0x79   :  { %16 = vst.msk [vmem:[#allocation0] sm:$0x1] %vm15_vm2, %v14_v18  }
  0x7a   :  { %22 = vst.msk [vmem:[#allocation0] sm:$0x1] %vm21_vm3, %v20_v17  }
  0x7b   :  { %28 = vst.msk [vmem:[#allocation0] sm:$0x1] %vm27_vm4, %v26_v19  }
  0x7c   :  { %v32_v20 = vpop.permute.xlu0 %31   ;;  %v38_v21 = vpop.permute.xlu1 %37  }
  0x7d   :  { %34 = vst.msk [vmem:[#allocation0] sm:$0x1] %vm33_vm5, %v32_v20  }
  0x7e   :  { %40 = vst.msk [vmem:[#allocation0] sm:$0x1] %vm39_vm6, %v38_v21  }
  0x80   :  { %v44_v22 = vpop.permute.xlu0 %43   ;;  %v50_v23 = vpop.permute.xlu1 %49  }
  0x81   :  { %46 = vst.msk [vmem:[#allocation0] sm:$0x1] %vm45_vm7, %v44_v22  }
  0x82   :  { %52 = vst.msk [vmem:[#allocation0] sm:$0x1] %vm51_vm8, %v50_v23  }
  0x84   :  { %v56_v24 = vpop.permute.xlu0 %55   ;;  %v62_v25 = vpop.permute.xlu1 %61  }
  0x85   :  { %58 = vst.msk [vmem:[#allocation0] sm:$0x1] %vm57_vm9, %v56_v24  }
  0x86   :  { %64 = vst.msk [vmem:[#allocation0] sm:$0x1] %vm63_vm10, %v62_v25  }
  0x88   :  { %v68_v26 = vpop.permute.xlu0 %67   ;;  %v74_v27 = vpop.permute.xlu1 %73  }
  0x89   :  { %70 = vst.msk [vmem:[#allocation0] sm:$0x1] %vm69_vm11, %v68_v26  }
  0x8a   :  { %76 = vst.msk [vmem:[#allocation0] sm:$0x1] %vm75_vm12, %v74_v27  }
  0x8c   :  { %v80_v28 = vpop.permute.xlu0 %79   ;;  %v86_v29 = vpop.permute.xlu1 %85  }
  0x8d   :  { %82 = vst.msk [vmem:[#allocation0] sm:$0x1] %vm81_vm13, %v80_v28  }
  0x8e   :  { %88 = vst.msk [vmem:[#allocation0] sm:$0x1] %vm87_vm14, %v86_v29  }
  0x90   :  { %v92_v30 = vpop.permute.xlu0 %91  }
  0x91   :  { %94 = vst.msk [vmem:[#allocation0] sm:$0x1] %vm93_vm15, %v92_v30  }
  0x98   :  { %v98_v31 = vld [vmem:[#allocation0] sm:$0x1] }
  0x99   :  { %100 = vst [vmem:[%s208_s1] sm:$0x1] %v98_v31 }

// kernel: conv_block_forward.1
= control target key start
LH: loop header
LB: loop body
LE: loop exit
PB: predicated region body
PF: predicated region fallthrough
CT: control target
= control target key end

     0   :  { %v931_v3 = vmov 0.0|0.0   ;;  %vm37_vm0 = vcmask 1046528   ;;  %vm57_vm1 = vcmask 523264   ;;  %vm244_vm2 = vcmask 1045504   ;;  %s1228_s1 = inlined_call_operand.vmem [shape: f32[3,64,128], index: 1, kind: input, shape index: {}]   ;;  %s1229_s0 = inlined_call_operand.vmem [shape: f32[2,18,64], index: 0, kind: input, shape index: {}]   ;;  %s1230_s3 = inlined_call_operand.vmem [shape: f32[128,128], index: 3, kind: input, shape index: {}]   ;;  %s1231_s2 = inlined_call_operand.vmem [shape: f32[3,128], index: 2, kind: input, shape index: {}]   ;;  %s1232_s4 = inlined_call_operand.vmem [shape: f32[32,128], index: 4, kind: output, shape index: {}]  }
   0x1   :  { %v587_v0 = vld [vmem:[%s1228_s1 + $0x40] sm:$0xff]  ;;  %v588_v1 = vld [vmem:[%s1228_s1 + $0x48] sm:$0xff]  ;;  %v589_v2 = vld [vmem:[%s1228_s1 + $0x50] sm:$0xff]  ;;  %870 = vmatprep.subr.bf16.mxu1 %v931_v3  ;;  %vm932_vm3 = vmmov 0  }
   0x2   :  { %v822_v4 = vpack.c.bf16 %v588_v1, %v587_v0  ;;  %v590_v5 = vld [vmem:[%s1228_s1 + $0x58] sm:$0xff]  ;;  %v591_v7 = vld [vmem:[%s1228_s1 + $0x60] sm:$0xff]  ;;  %v592_v8 = vld [vmem:[%s1228_s1 + $0x68] sm:$0xff] }
   0x3   :  { %v826_v6 = vpack.c.bf16 %v590_v5, %v589_v2  ;;  %v981_v9 = vld [vmem:[%s1229_s0] sm:$0xff]  ;;  %v986_v10 = vld [vmem:[%s1229_s0 + $0x8] sm:$0xff]  ;;  %v830_v13 = vpack.c.bf16 %v592_v8, %v591_v7  ;;  %v593_v14 = vld [vmem:[%s1228_s1 + $0x70] sm:$0xff] }
   0x4   :  { %823 = vmatprep.subr.bf16.mxu0 %v822_v4  ;;  %v38_v11 = vrot.slane %v981_v9, 1  ;;  %v39_v12 = vrot.slane %v986_v10, 1  ;;  %v594_v15 = vld [vmem:[%s1228_s1 + $0x78] sm:$0xff]  ;;  %v23_v17 = vld [vmem:[%s1228_s1] sm:$0xff]  ;;  %v24_v18 = vld [vmem:[%s1228_s1 + $0x8] sm:$0xff]  ;;  %v245_v53 = vrot.slane %v981_v9, 2 }
   0x5   :  { %825 = vmatpush3.bf16.msra.mxu0 %v822_v4  ;;  %v834_v19 = vpack.c.bf16 %v594_v15, %v593_v14  ;;  %v1007_v20 = vld [vmem:[%s1229_s0 + $0x10] sm:$0x3]  ;;  %v1012_v21 = vld [vmem:[%s1229_s0 + $0x18] sm:$0xff]  ;;  %v1017_v22 = vld [vmem:[%s1229_s0 + $0x20] sm:$0xff]  ;;  %v838_v29 = vpack.c.bf16 %v24_v18, %v23_v17  ;;  %v246_v54 = vrot.slane %v986_v10, 2 }
   0x6   :  { %827 = vmatprep.subr.bf16.mxu0 %v826_v6  ;;  %v40_v16 = vsel %vm37_vm0, %v38_v11, %v39_v12  ;;  %v396_v23 = vld [vmem:[%s1230_s3] sm:$0xff]  ;;  %v397_v24 = vld [vmem:[%s1230_s3 + $0x8] sm:$0xff]  ;;  %v398_v25 = vld [vmem:[%s1230_s3 + $0x10] sm:$0xff]  ;;  %v41_v28 = vrot.slane %v1007_v20, 1  ;;  %v43_v30 = vrot.slane %v1012_v21, 1  ;;  %v44_v31 = vrot.slane %v1017_v22, 1 }
   0x7   :  { %702 = vmatprep.mubr.msk.f32.mxu0 %vm57_vm1, %v40_v16  ;;  %v1028_v26 = vpack.c.bf16 %v397_v24, %v396_v23  ;;  %v399_v27 = vld [vmem:[%s1230_s3 + $0x18] sm:$0xff]  ;;  %v1039_v32 = vld [vmem:[%s1229_s0 + $0x28] sm:$0x3]  ;;  %v25_v34 = vld [vmem:[%s1228_s1 + $0x10] sm:$0xff]  ;;  %v247_v58 = vsel %vm244_vm2, %v245_v53, %v246_v54  ;;  %v248_v62 = vrot.slane %v1007_v20, 2  ;;  %v250_v63 = vrot.slane %v1012_v21, 2 }
   0x8   :  { %v1042_v33 = vpack.c.bf16 %v399_v27, %v398_v25  ;;  %v26_v35 = vld [vmem:[%s1228_s1 + $0x18] sm:$0xff]  ;;  %v42_v36 = vsel %vm37_vm0, %v39_v12, %v41_v28  ;;  %v46_v37 = vrot.slane %v1039_v32, 1  ;;  %v45_v39 = vsel %vm37_vm0, %v43_v30, %v44_v31  ;;  %v27_v40 = vld [vmem:[%s1228_s1 + $0x20] sm:$0xff]  ;;  %v28_v41 = vld [vmem:[%s1228_s1 + $0x28] sm:$0xff] }
   0x9   :  { %829 = vmatpush3.bf16.msra.mxu0 %v826_v6  ;;  %872 = vmatpush3.bf16.msra.mxu1 %v1028_v26  ;;  %v842_v38 = vpack.c.bf16 %v26_v35, %v25_v34  ;;  %v846_v43 = vpack.c.bf16 %v28_v41, %v27_v40  ;;  %v29_v44 = vld [vmem:[%s1228_s1 + $0x30] sm:$0xff]  ;;  %v30_v45 = vld [vmem:[%s1228_s1 + $0x38] sm:$0xff]  ;;  %v603_v47 = vld [vmem:[%s1228_s1 + $0x80] sm:$0xff]  ;;  %v251_v0 = vrot.slane %v1017_v22, 2  ;;  %v249_v1 = vsel %vm244_vm2, %v246_v54, %v248_v62 }
   0xa   :  { %831 = vmatprep.subr.bf16.mxu0 %v830_v13  ;;  %873 = vmatprep.subr.bf16.mxu1 %v931_v3  ;;  %v47_v42 = vsel %vm37_vm0, %v44_v31, %v46_v37  ;;  %v850_v46 = vpack.c.bf16 %v30_v45, %v29_v44  ;;  %v604_v48 = vld [vmem:[%s1228_s1 + $0x88] sm:$0xff]  ;;  %v605_v50 = vld [vmem:[%s1228_s1 + $0x90] sm:$0xff]  ;;  %v606_v51 = vld [vmem:[%s1228_s1 + $0x98] sm:$0xff]  ;;  %v253_v2 = vrot.slane %v1039_v32, 2  ;;  %v933_v23 = vmov 0.0  }
   0xb   :  { %v854_v49 = vpack.c.bf16 %v604_v48, %v603_v47  ;;  %v858_v52 = vpack.c.bf16 %v606_v51, %v605_v50  ;;  %v607_v55 = vld [vmem:[%s1228_s1 + $0xa0] sm:$0xff]  ;;  %v608_v56 = vld [vmem:[%s1228_s1 + $0xa8] sm:$0xff]  ;;  %v609_v59 = vld [vmem:[%s1228_s1 + $0xb0] sm:$0xff]  ;;  %v252_v4 = vsel %vm244_vm2, %v250_v63, %v251_v0  ;;  %784 = vmatprep.mubr.msk.f32.mxu1 %vm932_vm3, %v933_v23 }
   0xc   :  { %v862_v57 = vpack.c.bf16 %v608_v56, %v607_v55  ;;  %v610_v60 = vld [vmem:[%s1228_s1 + $0xb8] sm:$0xff]  ;;  %v254_v5 = vsel %vm244_vm2, %v251_v0, %v253_v2  ;;  %v400_v6 = vld [vmem:[%s1230_s3 + $0x20] sm:$0xff]  ;;  %v401_v7 = vld [vmem:[%s1230_s3 + $0x28] sm:$0xff] }
   0xd   :  { %833 = vmatpush3.bf16.msra.mxu0 %v830_v13  ;;  %875 = vmatpush3.bf16.msra.mxu1 %v1042_v33  ;;  %v866_v61 = vpack.c.bf16 %v610_v60, %v609_v59  ;;  %v1124_v8 = vpack.c.bf16 %v401_v7, %v400_v6  ;;  %v404_v12 = vld [vmem:[%s1230_s3 + $0x40] sm:$0xff]  ;;  %v405_v13 = vld [vmem:[%s1230_s3 + $0x48] sm:$0xff]  ;;  %v406_v15 = vld [vmem:[%s1230_s3 + $0x50] sm:$0xff]  ;;  %v563_v6 = vlaneseq }
   0xe   :  { %835 = vmatprep.subr.bf16.mxu0 %v834_v19  ;;  %876 = vmatprep.subr.bf16.mxu1 %v931_v3  ;;  %v1144_v14 = vpack.c.bf16 %v405_v13, %v404_v12  ;;  %v407_v16 = vld [vmem:[%s1230_s3 + $0x58] sm:$0xff]  ;;  %v408_v18 = vld [vmem:[%s1230_s3 + $0x60] sm:$0xff] }
   0xf   :  { %v886_v17 = vpack.c.bf16 %v407_v16, %v406_v15  ;;  %v615_v25 = vld [vmem:[%s1231_s2] ss:$0 sm:$0xff]  ;;  %v564_v7 = vshrl.u32 %v563_v6, 7 }
  0x11   :  { %837 = vmatpush3.bf16.msra.mxu0 %v834_v19  ;;  %878 = vmatpush3.bf16.msra.mxu1 %v1124_v8  ;;  %v409_v19 = vld [vmem:[%s1230_s3 + $0x68] sm:$0xff] }
  0x12   :  { %839 = vmatprep.subr.bf16.mxu0 %v838_v29  ;;  %879 = vmatprep.subr.bf16.mxu1 %v931_v3  ;;  %v889_v20 = vpack.c.bf16 %v409_v19, %v408_v18 }
  0x14   :  { %703 = vmatmul.mubr.msk.f32.vlgmr.msra.gmra.mrb[0].mxu0 %vm57_vm1, %v42_v36 }
  0x15   :  { %841 = vmatpush3.bf16.msra.mxu0 %v838_v29  ;;  %705 = vmatprep.mubr.msk.f32.mxu0 %vm57_vm1, %v45_v39 }
  0x16   :  { %843 = vmatprep.subr.bf16.mxu0 %v842_v38 }
  0x18   :  { %706 = vmatmul.mubr.msk.f32.gmra.mrb[2].mxu0 %vm57_vm1, %v47_v42 }
  0x19   :  { %845 = vmatpush3.bf16.msra.mxu0 %v842_v38  ;;  %724 = vmatprep.mubr.msk.f32.mxu0 %vm57_vm1, %v981_v9  ;;  %v402_v9 = vld [vmem:[%s1230_s3 + $0x30] sm:$0xff] }
  0x1a   :  { %847 = vmatprep.subr.bf16.mxu0 %v846_v43 }
  0x1d   :  { %849 = vmatpush3.bf16.msra.mxu0 %v846_v43 }
  0x1e   :  { %851 = vmatprep.subr.bf16.mxu0 %v850_v46 }
  0x21   :  { %853 = vmatpush3.bf16.msra.mxu0 %v850_v46 }
  0x22   :  { %855 = vmatprep.subr.bf16.mxu0 %v854_v49 }
  0x24   :  { %725 = vmatmul.mubr.msk.f32.vlgmr.msra.gmra.mrb[0].mxu0 %vm57_vm1, %v986_v10  ;;  %v403_v10 = vld [vmem:[%s1230_s3 + $0x38] sm:$0xff] }
  0x25   :  { %857 = vmatpush3.bf16.msra.mxu0 %v854_v49  ;;  %727 = vmatprep.mubr.msk.f32.mxu0 %vm57_vm1, %v1012_v21  ;;  %v1134_v11 = vpack.c.bf16 %v403_v10, %v402_v9  ;;  %v410_v21 = vld [vmem:[%s1230_s3 + $0x70] sm:$0xff] }
  0x26   :  { %859 = vmatprep.subr.bf16.mxu0 %v858_v52 }
  0x27   :  { %881 = vmatpush3.bf16.msra.mxu1 %v1134_v11 }
  0x28   :  { %728 = vmatmul.mubr.msk.f32.gmra.mrb[2].mxu0 %vm57_vm1, %v1017_v22  ;;  %882 = vmatprep.subr.bf16.mxu1 %v931_v3  ;;  %v411_v22 = vld [vmem:[%s1230_s3 + $0x78] sm:$0xff] }
  0x29   :  { %861 = vmatpush3.bf16.msra.mxu0 %v858_v52  ;;  %746 = vmatprep.mubr.msk.f32.mxu0 %vm57_vm1, %v247_v58  ;;  %v892_v24 = vpack.c.bf16 %v411_v22, %v410_v21 }
  0x2a   :  { %863 = vmatprep.subr.bf16.mxu0 %v862_v57 }
  0x2b   :  { %884 = vmatpush3.bf16.msra.mxu1 %v1144_v14 }
  0x2c   :  { %885 = vmatprep.subr.bf16.mxu1 %v931_v3 }
  0x2d   :  { %865 = vmatpush3.bf16.msra.mxu0 %v862_v57 }
  0x2e   :  { %867 = vmatprep.subr.bf16.mxu0 %v866_v61 }
  0x2f   :  { %887 = vmatpush3.bf16.msra.mxu1 %v886_v17 }
  0x30   :  { %888 = vmatprep.subr.bf16.mxu1 %v931_v3 }
  0x31   :  { %869 = vmatpush3.bf16.msra.mxu0 %v866_v61 }
  0x33   :  { %890 = vmatpush3.bf16.msra.mxu1 %v889_v20 }
  0x34   :  { %747 = vmatmul.mubr.msk.f32.vlgmr.msra.gmra.mrb[0].mxu0 %vm57_vm1, %v249_v1  ;;  %891 = vmatprep.subr.bf16.mxu1 %v931_v3 }
  0x35   :  { %749 = vmatprep.mubr.msk.f32.mxu0 %vm57_vm1, %v252_v4 }
  0x37   :  { %893 = vmatpush3.bf16.msra.mxu1 %v892_v24 }
  0x38   :  { %750 = vmatmul.mubr.msk.f32.gmra.mrb[2].mxu0 %vm57_vm1, %v254_v5  ;;  %894 = vmatprep.subr.bf16.mxu1 %v931_v3 }
 0x107   :  { %v748_v27 = vpop.f32.mrb[0].mxu0 }
 0x108   :  { %v367_v28 = vadd.f32 %v748_v27, %v615_v25  ;;  %v338_v29 = vpop.f32.mrb[1].mxu0 }
 0x109   :  { %v366_v30 = vadd.f32 %v615_v25, %v338_v29 }
 0x10a   :  { %v1173_v31 = vmax.f32 %v367_v28, 0.0 }
 0x10b   :  { %v1175_v32 = vmax.f32 %v366_v30, 0.0  ;;  %v751_v34 = vpop.f32.mrb[2].mxu0 }
 0x10c   :  { %v348_v35 = vpop.f32.mrb[3].mxu0  ;;  %v369_v36 = vadd.f32 %v751_v34, %v615_v25  ;;  %v384_v47 = vmul.f32 %v1173_v31, %v1173_v31 }
 0x10d   :  { %v368_v37 = vadd.f32 %v615_v25, %v348_v35  ;;  %v374_v38 = vadd.f32 %v1173_v31, %v1175_v32  ;;  %v383_v48 = vmul.f32 %v1175_v32, %v1175_v32 }
 0x10e   :  { %v1181_v40 = vmax.f32 %v369_v36, 0.0 }
 0x10f   :  { %v1179_v39 = vmax.f32 %v368_v37, 0.0  ;;  %v387_v52 = vadd.f32 %v384_v47, %v383_v48 }
 0x110   :  { %v386_v54 = vmul.f32 %v1181_v40, %v1181_v40 }
 0x111   :  { %v375_v41 = vadd.f32 %v374_v38, %v1179_v39  ;;  %v385_v50 = vmul.f32 %v1179_v39, %v1179_v39 }
 0x113   :  { %v376_v42 = vadd.f32 %v375_v41, %v1181_v40  ;;  %v388_v53 = vadd.f32 %v387_v52, %v385_v50 }
 0x115   :  { %v377_v43 = vrot.slane %v376_v42, 4  ;;  %v389_v55 = vadd.f32 %v388_v53, %v386_v54 }
 0x117   :  { %v378_v44 = vadd.f32 %v377_v43, %v376_v42  ;;  %v390_v56 = vrot.slane %v389_v55, 4 }
 0x119   :  { %v379_v45 = vrot.slane %v378_v44, 2 }
 0x11b   :  { %v380_v46 = vadd.f32 %v379_v45, %v378_v44 }
 0x11d   :  { %v381_v49 = vrot.slane %v380_v46, 1 }
 0x11f   :  { %v382_v51 = vadd.f32 %v381_v49, %v380_v46 }
 0x121   :  { %785 = vmatmul.mubr.f32.vlgmr.msra.gmra.mrb[0].mxu1 %v382_v51 }
 0x122   :  { %896 = vmatpush3.bf16.msra.mxu1 %v1028_v26  ;;  %819 = vmatprep.mubr.msk.f32.mxu1 %vm932_vm3, %v933_v23  ;;  %v391_v26 = vadd.f32 %v390_v56, %v389_v55 }
 0x123   :  { %897 = vmatprep.subr.bf16.mxu1 %v931_v3 }
 0x124   :  { %v392_v57 = vrot.slane %v391_v26, 2 }
 0x126   :  { %899 = vmatpush3.bf16.msra.mxu1 %v1042_v33  ;;  %v393_v33 = vadd.f32 %v392_v57, %v391_v26 }
 0x127   :  { %900 = vmatprep.subr.bf16.mxu1 %v931_v3 }
 0x128   :  { %v394_v58 = vrot.slane %v393_v33, 1 }
 0x12a   :  { %902 = vmatpush3.bf16.msra.mxu1 %v1124_v8  ;;  %v395_v59 = vadd.f32 %v394_v58, %v393_v33  ;;  %v565_v8 = vsub.s32 0, %v564_v7 }
 0x12b   :  { %903 = vmatprep.subr.bf16.mxu1 %v931_v3 }
 0x12e   :  { %905 = vmatpush3.bf16.msra.mxu1 %v1134_v11  ;;  %v560_v11 = vld [vmem:[%s1231_s2 + $0x2] sm:$0x1] }
 0x12f   :  { %906 = vmatprep.subr.bf16.mxu1 %v931_v3 }
 0x132   :  { %908 = vmatpush3.bf16.msra.mxu1 %v1144_v14 }
 0x133   :  { %909 = vmatprep.subr.bf16.mxu1 %v931_v3 }
 0x136   :  { %911 = vmatpush3.bf16.msra.mxu1 %v886_v17 }
 0x137   :  { %912 = vmatprep.subr.bf16.mxu1 %v931_v3 }
 0x13a   :  { %914 = vmatpush3.bf16.msra.mxu1 %v889_v20 }
 0x13b   :  { %915 = vmatprep.subr.bf16.mxu1 %v931_v3  ;;  %v558_v3 = vld [vmem:[%s1231_s2 + $0x1] sm:$0x1] }
 0x13e   :  { %917 = vmatpush3.bf16.msra.mxu1 %v892_v24 }
 0x141   :  { %820 = vmatmul.mubr.f32.vlgmr.msra.gmra.mrb[2].mxu1 %v395_v59 }
 0x1f4   :  { %v478_v60 = vpop.f32.mrb[0].mxu1 }
 0x1f5   :  { %v786_v61 = vpop.f32.mrb[1].mxu1  ;;  %v552_v62 = vmul.f32 0.001953125, %v478_v60 }
 0x1f7   :  { %v554_v0 = vmul.f32 %v552_v62, %v552_v62 }
 0x214   :  { %v548_v63 = vpop.f32.mrb[2].mxu1 }
 0x215   :  { %v553_v1 = vmul.f32 0.001953125, %v548_v63  ;;  %v821_v2 = vpop.f32.mrb[3].mxu1 }
 0x217   :  { %v555_v4 = vsub.f32 %v553_v1, %v554_v0 }
 0x219   :  { %v556_v5 = vadd.f32 1e-05, %v555_v4 }
 0x21b   :  { %929 = vrsqrt.f32 %v556_v5 }
 0x225   :  { %v930_v9 = vpop.eup %929 }
 0x226   :  { %v559_v10 = vmul.f32 %v930_v9, %v558_v3 }
 0x228   :  { %v561_v12 = vmul.f32 %v559_v10, %v552_v62  ;;  %v566_v13 = vrot.slane %v559_v10, %v565_v8 }
 0x22a   :  { %v562_v14 = vsub.f32 %v560_v11, %v561_v12  ;;  %v567_v15 = vmul.f32 %v566_v13, %v1175_v32  ;;  %v568_v16 = vmul.f32 %v566_v13, %v1173_v31  ;;  %v569_v17 = vmul.f32 %v566_v13, %v1179_v39 }
 0x22b   :  { %v570_v18 = vmul.f32 %v566_v13, %v1181_v40 }
 0x22c   :  { %v574_v19 = vrot.slane %v562_v14, %v565_v8 }
 0x22e   :  { %v575_v20 = vadd.f32 %v574_v19, %v567_v15  ;;  %v576_v21 = vadd.f32 %v574_v19, %v568_v16  ;;  %v577_v22 = vadd.f32 %v574_v19, %v569_v17  ;;  %v578_v23 = vadd.f32 %v574_v19, %v570_v18 }
 0x230   :  { %579 = vst [vmem:[%s1232_s4] sm:$0xff] %v575_v20  ;;  %580 = vst [vmem:[%s1232_s4 + $0x8] sm:$0xff] %v576_v21 }
 0x231   :  { %581 = vst [vmem:[%s1232_s4 + $0x10] sm:$0xff] %v577_v22  ;;  %582 = vst [vmem:[%s1232_s4 + $0x18] sm:$0xff] %v578_v23 }

</bundles_post_ra>
